<compile_context>
chip_gen: v7x
topology: tpu7x:2x2x1
jax: 0.10.0
libtpu: 0.0.40
codegen_flags: <defaults>
</compile_context>

<pallas_src>
import jax
import jax.numpy as jnp
from jax.experimental import pallas as pl
from jax.experimental.pallas import tpu as pltpu

_D_IN = 28 * 28          # 784
_H1 = 128
_H2 = 64
_H2_PAD = 128            # lane-dense padded hidden width (layer-2 out / layer-3 in)
_OUT = 32


def _mlp_kernel(x_ref, w1_ref, b1_ref, w2_ref, b2_ref, w3_ref, b3_ref, o_ref):
    # All weights are tiny (~230 KB bf16) and use constant-index BlockSpecs, so
    # they are fetched once and stay resident across the batch grid.
    cd = w1_ref.dtype                                   # bf16 compute dtype
    x = x_ref[...].astype(cd)                           # in-kernel f32 -> bf16 cast
    h = jnp.dot(x, w1_ref[...], preferred_element_type=jnp.float32) + b1_ref[...]
    h = jnp.maximum(h, 0.0).astype(cd)                  # bias+ReLU in f32, bf16 at MXU boundary
    h = jnp.dot(h, w2_ref[...], preferred_element_type=jnp.float32) + b2_ref[...]
    h = jnp.maximum(h, 0.0).astype(cd)
    h = jnp.dot(h, w3_ref[...], preferred_element_type=jnp.float32) + b3_ref[...]
    o_ref[...] = h.astype(o_ref.dtype)                  # (tb, 32) un-padded, lane-masked store


def _round_up(v, m):
    return ((v + m - 1) // m) * m


def _choose_tb(batch):
    """Batch tile: full-extent single tile for small batches; otherwise aim for
    >= 4 grid steps (2 per TC on v7x), sublane multiple of 8 (f32 x / f32 out),
    capped at 512 rows to keep VMEM well inside v7x's 64 MiB."""
    if batch < 32:
        return batch                       # block dim == full dim: always legal
    tb = _round_up(pl.cdiv(batch, 4), 8)
    return min(512, tb)


def encoder_forward(x, params, *, tb=None, compute_dtype=jnp.bfloat16, out_dtype=None):
    """x: (B, 784) float32 (or bf16); params: w1,b1,w2,b2,w3,b3 with w* stored (in, out)."""
    B, d_in = x.shape
    assert d_in == _D_IN
    if out_dtype is None:
        out_dtype = x.dtype                # pass out_dtype=jnp.bfloat16 to halve write traffic

    if tb is None:
        tb = _choose_tb(B)
    else:
        tb = min(int(tb), B)
        if tb < B:
            tb = _round_up(tb, 8)          # enforce sublane multiple when tiling

    grid = (pl.cdiv(B, tb),)               # ragged last block: no batch padding needed

    # Weight prep (one-time, tiny): bf16 streaming for W, biases in f32.
    w1 = params["w1"].astype(compute_dtype)
    b1 = params["b1"].astype(jnp.float32)
    # Pad hidden 64 -> 128 with zeros: zero cols of h2 hit zero rows of w3 -> no math change.
    w2 = jnp.pad(params["w2"], ((0, 0), (0, _H2_PAD - _H2))).astype(compute_dtype)
    b2 = jnp.pad(params["b2"], ((0, 0), (0, _H2_PAD - _H2))).astype(jnp.float32)
    w3 = jnp.pad(params["w3"], ((0, _H2_PAD - _H2), (0, 0))).astype(compute_dtype)
    b3 = params["b3"].astype(jnp.float32)

    full = lambda i: (0, 0)                # weights/biases: same (only) block every step

    out = pl.pallas_call(
        _mlp_kernel,
        out_shape=jax.ShapeDtypeStruct((B, _OUT), out_dtype),
        grid_spec=pltpu.PrefetchScalarGridSpec(
            num_scalar_prefetch=0,
            grid=grid,
            in_specs=[
                pl.BlockSpec((tb, _D_IN), lambda i: (i, 0)),   # x tile, f32, cast in-kernel
                pl.BlockSpec((_D_IN, _H1), full),              # w1 (784,128) bf16
                pl.BlockSpec((1, _H1), full),                  # b1 (1,128)   f32
                pl.BlockSpec((_H1, _H2_PAD), full),            # w2 (128,128) bf16 (padded)
                pl.BlockSpec((1, _H2_PAD), full),              # b2 (1,128)   f32 (padded)
                pl.BlockSpec((_H2_PAD, _OUT), full),           # w3 (128,32)  bf16 (padded rows)
                pl.BlockSpec((1, _OUT), full),                 # b3 (1,32)    f32
            ],
            out_specs=pl.BlockSpec((tb, _OUT), lambda i: (i, 0)),
        ),
        compiler_params=pltpu.CompilerParams(
            dimension_semantics=("parallel",),
            vmem_limit_bytes=32 * 1024 * 1024,   # ~5 MB used at tb=512; safe on 64 MiB v7x
        ),
    )(x, w1, b1, w2, b2, w3, b3)

    return out


def init_params(key):
    """Deterministic synthetic init matching the PyTorch module's shapes.
    PyTorch stores Linear weights as (out, in); we keep them as (in, out) so
    the kernel multiplies x @ W directly."""
    ks = jax.random.split(key, 6)

    def lin(kw, kb, fan_in, fan_out):
        bound = 1.0 / jnp.sqrt(fan_in)
        w = jax.random.uniform(kw, (fan_in, fan_out), jnp.float32, -bound, bound)
        b = jax.random.uniform(kb, (1, fan_out), jnp.float32, -bound, bound)
        return w, b

    w1, b1 = lin(ks[0], ks[1], _D_IN, _H1)
    w2, b2 = lin(ks[2], ks[3], _H1, _H2)
    w3, b3 = lin(ks[4], ks[5], _H2, _OUT)
    return dict(w1=w1, b1=b1, w2=w2, b2=b2, w3=w3, b3=b3)


def encoder_ref_bf16(x, p, compute_dtype=jnp.bfloat16):
    """Pure-JAX reference mirroring the kernel's bf16-stream / f32-accumulate math."""
    cd = compute_dtype
    h = jnp.dot(x.astype(cd), p["w1"].astype(cd), preferred_element_type=jnp.float32) + p["b1"]
    h = jnp.maximum(h, 0.0).astype(cd)
    h = jnp.dot(h, p["w2"].astype(cd), preferred_element_type=jnp.float32) + p["b2"]
    h = jnp.maximum(h, 0.0).astype(cd)
    return jnp.dot(h, p["w3"].astype(cd), preferred_element_type=jnp.float32) + p["b3"]


def encoder_ref_f32(x, p):
    """Full-f32 reference with identical semantics to the PyTorch module."""
    h = jnp.maximum(x @ p["w1"] + p["b1"], 0.0)
    h = jnp.maximum(h @ p["w2"] + p["b2"], 0.0)
    return h @ p["w3"] + p["b3"]


if __name__ == "__main__":
    key = jax.random.PRNGKey(0)
    k_param, k_x = jax.random.split(key)

    params = init_params(k_param)
    B = 64  # tile chooser -> tb=16, grid=4 (>= 2 steps per TC on v7x)
    x = jax.random.normal(k_x, (B, _D_IN), jnp.float32)

    out = jax.block_until_ready(encoder_forward(x, params))
    assert out.shape == (B, _OUT), out.shape

    # Exact-ish check vs a reference mirroring the kernel's mixed-precision math...
    ref_mixed = encoder_ref_bf16(x, params)
    assert jnp.allclose(out, ref_mixed, atol=2e-2, rtol=2e-2), "mismatch vs bf16 reference"

    # ...and a loose check vs the pure-f32 PyTorch-module semantics (bf16 inputs
    # over a 784-deep dot; tolerance kept generous for robustness across seeds).
    ref_f32 = encoder_ref_f32(x, params)
    max_err = float(jnp.max(jnp.abs(out - ref_f32)))
    assert max_err < 0.15, f"mismatch vs f32 reference (max abs err {max_err})"

    print("KERNEL_OK")
</pallas_src>

<mosaic_0001>
module attributes {stable_mosaic.version = 11 : i64} {
  func.func @_mlp_kernel(%arg0: i32, %arg1: memref<16x784xf32, #tpu.memory_space<vmem>>, %arg2: memref<784x128xbf16, #tpu.memory_space<vmem>>, %arg3: memref<1x128xf32, #tpu.memory_space<vmem>>, %arg4: memref<128x128xbf16, #tpu.memory_space<vmem>>, %arg5: memref<1x128xf32, #tpu.memory_space<vmem>>, %arg6: memref<128x32xbf16, #tpu.memory_space<vmem>>, %arg7: memref<1x32xf32, #tpu.memory_space<vmem>>, %arg8: memref<16x32xf32, #tpu.memory_space<vmem>>) attributes {dimension_semantics = [#tpu.dimension_semantics<parallel>], iteration_bounds = array<i64: 4>, scalar_prefetch = 0 : i64, scratch_operands = 0 : i64, tpu.core_type = #tpu.core_type<tc>, window_params = [{transform_indices = @transform_0, window_bounds = array<i64: 16, 784>}, {pipeline_mode = #tpu.pipeline_mode<synchronous>, transform_indices = @transform_1, window_bounds = array<i64: 784, 128>}, {pipeline_mode = #tpu.pipeline_mode<synchronous>, transform_indices = @transform_2, window_bounds = array<i64: 1, 128>}, {pipeline_mode = #tpu.pipeline_mode<synchronous>, transform_indices = @transform_3, window_bounds = array<i64: 128, 128>}, {pipeline_mode = #tpu.pipeline_mode<synchronous>, transform_indices = @transform_4, window_bounds = array<i64: 1, 128>}, {pipeline_mode = #tpu.pipeline_mode<synchronous>, transform_indices = @transform_5, window_bounds = array<i64: 128, 32>}, {pipeline_mode = #tpu.pipeline_mode<synchronous>, transform_indices = @transform_6, window_bounds = array<i64: 1, 32>}, {transform_indices = @transform_7, window_bounds = array<i64: 16, 32>}]} {
    %c0 = arith.constant 0 : index
    %c0_0 = arith.constant 0 : index
    %0 = vector.load %arg1[%c0, %c0_0] : memref<16x784xf32, #tpu.memory_space<vmem>>, vector<16x784xf32>
    %1 = arith.truncf %0 : vector<16x784xf32> to vector<16x784xbf16>
    %c0_1 = arith.constant 0 : index
    %c0_2 = arith.constant 0 : index
    %2 = vector.load %arg2[%c0_1, %c0_2] : memref<784x128xbf16, #tpu.memory_space<vmem>>, vector<784x128xbf16>
    %cst = arith.constant dense<0.000000e+00> : vector<16x128xf32>
    %3 = tpu.matmul %1, %2, %cst {dimension_numbers = #tpu.dot_dimension_numbers<[1], [0], [0], [1], [0, 0, 1, 1], [], []>} : vector<16x784xbf16>, vector<784x128xbf16>, vector<16x128xf32> -> vector<16x128xf32>
    %c0_3 = arith.constant 0 : index
    %c0_4 = arith.constant 0 : index
    %4 = vector.load %arg3[%c0_3, %c0_4] : memref<1x128xf32, #tpu.memory_space<vmem>>, vector<1x128xf32>
    %5 = vector.broadcast %4 : vector<1x128xf32> to vector<16x128xf32>
    %6 = arith.addf %3, %5 : vector<16x128xf32>
    %cst_5 = arith.constant 0.000000e+00 : f32
    %7 = vector.broadcast %cst_5 : f32 to vector<16x128xf32>
    %8 = arith.maximumf %6, %7 : vector<16x128xf32>
    %9 = arith.truncf %8 : vector<16x128xf32> to vector<16x128xbf16>
    %c0_6 = arith.constant 0 : index
    %c0_7 = arith.constant 0 : index
    %10 = vector.load %arg4[%c0_6, %c0_7] : memref<128x128xbf16, #tpu.memory_space<vmem>>, vector<128x128xbf16>
    %cst_8 = arith.constant dense<0.000000e+00> : vector<16x128xf32>
    %11 = tpu.matmul %9, %10, %cst_8 {dimension_numbers = #tpu.dot_dimension_numbers<[1], [0], [0], [1], [0, 0, 1, 1], [], []>} : vector<16x128xbf16>, vector<128x128xbf16>, vector<16x128xf32> -> vector<16x128xf32>
    %c0_9 = arith.constant 0 : index
    %c0_10 = arith.constant 0 : index
    %12 = vector.load %arg5[%c0_9, %c0_10] : memref<1x128xf32, #tpu.memory_space<vmem>>, vector<1x128xf32>
    %13 = vector.broadcast %12 : vector<1x128xf32> to vector<16x128xf32>
    %14 = arith.addf %11, %13 : vector<16x128xf32>
    %cst_11 = arith.constant 0.000000e+00 : f32
    %15 = vector.broadcast %cst_11 : f32 to vector<16x128xf32>
    %16 = arith.maximumf %14, %15 : vector<16x128xf32>
    %17 = arith.truncf %16 : vector<16x128xf32> to vector<16x128xbf16>
    %c0_12 = arith.constant 0 : index
    %c0_13 = arith.constant 0 : index
    %18 = vector.load %arg6[%c0_12, %c0_13] : memref<128x32xbf16, #tpu.memory_space<vmem>>, vector<128x32xbf16>
    %cst_14 = arith.constant dense<0.000000e+00> : vector<16x32xf32>
    %19 = tpu.matmul %17, %18, %cst_14 {dimension_numbers = #tpu.dot_dimension_numbers<[1], [0], [0], [1], [0, 0, 1, 1], [], []>} : vector<16x128xbf16>, vector<128x32xbf16>, vector<16x32xf32> -> vector<16x32xf32>
    %c0_15 = arith.constant 0 : index
    %c0_16 = arith.constant 0 : index
    %20 = vector.load %arg7[%c0_15, %c0_16] : memref<1x32xf32, #tpu.memory_space<vmem>>, vector<1x32xf32>
    %21 = vector.broadcast %20 : vector<1x32xf32> to vector<16x32xf32>
    %22 = arith.addf %19, %21 : vector<16x32xf32>
    %c0_17 = arith.constant 0 : index
    %c0_18 = arith.constant 0 : index
    %23 = vector.load %arg8[%c0_17, %c0_18] : memref<16x32xf32, #tpu.memory_space<vmem>>, vector<16x32xf32>
    tpu.vector_store %arg8[%c0_17, %c0_18], %22 {strides = array<i32>} : memref<16x32xf32, #tpu.memory_space<vmem>>, vector<16x32xf32>,
    return
  }
  func.func @transform_0(%arg0: i32) -> (i32, i32) {
    %c0_i32 = arith.constant 0 : i32
    %c0_i32_0 = arith.constant 0 : i32
    return %arg0, %c0_i32 : i32, i32
  }
  func.func @transform_1(%arg0: i32) -> (i32, i32) {
    %c0_i32 = arith.constant 0 : i32
    %c0_i32_0 = arith.constant 0 : i32
    %c0_i32_1 = arith.constant 0 : i32
    return %c0_i32, %c0_i32_0 : i32, i32
  }
  func.func @transform_2(%arg0: i32) -> (i32, i32) {
    %c0_i32 = arith.constant 0 : i32
    %c0_i32_0 = arith.constant 0 : i32
    %c0_i32_1 = arith.constant 0 : i32
    return %c0_i32, %c0_i32_0 : i32, i32
  }
  func.func @transform_3(%arg0: i32) -> (i32, i32) {
    %c0_i32 = arith.constant 0 : i32
    %c0_i32_0 = arith.constant 0 : i32
    %c0_i32_1 = arith.constant 0 : i32
    return %c0_i32, %c0_i32_0 : i32, i32
  }
  func.func @transform_4(%arg0: i32) -> (i32, i32) {
    %c0_i32 = arith.constant 0 : i32
    %c0_i32_0 = arith.constant 0 : i32
    %c0_i32_1 = arith.constant 0 : i32
    return %c0_i32, %c0_i32_0 : i32, i32
  }
  func.func @transform_5(%arg0: i32) -> (i32, i32) {
    %c0_i32 = arith.constant 0 : i32
    %c0_i32_0 = arith.constant 0 : i32
    %c0_i32_1 = arith.constant 0 : i32
    return %c0_i32, %c0_i32_0 : i32, i32
  }
  func.func @transform_6(%arg0: i32) -> (i32, i32) {
    %c0_i32 = arith.constant 0 : i32
    %c0_i32_0 = arith.constant 0 : i32
    %c0_i32_1 = arith.constant 0 : i32
    return %c0_i32, %c0_i32_0 : i32, i32
  }
  func.func @transform_7(%arg0: i32) -> (i32, i32) {
    %c0_i32 = arith.constant 0 : i32
    %c0_i32_0 = arith.constant 0 : i32
    return %arg0, %c0_i32 : i32, i32
  }
}

</mosaic_0001>

<bundles_post_ra>
// kernel: tpu_custom_call.1
= control target key start
LH: loop header
LB: loop body
LE: loop exit
PB: predicated region body
PF: predicated region fallthrough
CT: control target
= control target key end

     0   :  { %12 = vsyncpa [#allocation3], 0  ;;  %s1942_s0 = inlined_call_operand.hbm [shape: f32[64,784], index: 0, kind: input, shape index: {}]   ;;  %s1943_s1 = inlined_call_operand.hbm [shape: bf16[784,128], index: 1, kind: input, shape index: {}]   ;;  %s1944_s2 = inlined_call_operand.vmem [shape: f32[1,128], index: 2, kind: input, shape index: {}]   ;;  %s1945_s3 = inlined_call_operand.vmem [shape: bf16[128,128], index: 3, kind: input, shape index: {}]   ;;  %s1946_s4 = inlined_call_operand.vmem [shape: f32[1,128], index: 4, kind: input, shape index: {}]   ;;  %s1947_s5 = inlined_call_operand.vmem [shape: bf16[128,32], index: 5, kind: input, shape index: {}]   ;;  %s1948_s6 = inlined_call_operand.vmem [shape: f32[1,32], index: 6, kind: input, shape index: {}]   ;;  %s1949_s7 = inlined_call_operand.vmem [shape: f32[64,32], index: 7, kind: output, shape index: {}]  }
   0x1   :  { %14 = vsyncpa [#allocation3 + $0x1], 0 }
   0x2   :  { %15 = vsyncpa [#allocation5], 0  ;;  %s1701_s24 = smov 0   ;;  %s1703_s25 = smov 0  }
   0x3   :  { %s1705_s26 = smov 0   ;;  %s1707_s27 = smov 0  }
   0x4 LB: > { %s1216_s28 = sadd.s32 4294967295, %s1651_s27   ;;  %p41_p0 = scmp.ne.s32.totalorder %s1643_s25, %s1639_s24  ;;  %s1651_s27 = sphi %s1707_s27, %s1965_s27   ;;  %s1647_s26 = sphi %s1705_s26, %s1964_s26   ;;  %s1643_s25 = sphi %s1703_s25, %s1963_s25   ;;  %s1639_s24 = sphi %s1701_s24, %s1962_s24  }
   0x5   : > { %p1723_p1 = scmp.eq.s32.totalorder %s1216_s28, 0  ;;  %p1218_p2 = scmp.ge.s32.totalorder %s1651_s27, 1 }
   0x6   : > { %p204_p3 = scmp.lt.s32.totalorder %s1651_s27, 5  ;;  %s1653_s9 = smov [#allocation4]  }
   0x7   : > { %s1954_s29 = scalar_select %p1723_p1, 1, 0 }
   0x8   : > { %p1731_p4 = por %p1723_p1, %p41_p0  ;;  %p1735_p5 = pnand %p1218_p2, %p204_p3 }
   0x9   : > { %s216_s10 = sshll.u32 %s1653_s9, 4  ;;  %s1748_s12 = sadd.s32 1, %s1651_s27   ;;  %s217_s10 = int_to_ptr.vmem [resolvable:$true] %s216_s10 }
   0xa   : > { %s1955_s30 = scalar_select %p1731_p4, 1, 0 }
   0xb   : > { %s1956_s8 = scalar_select %p1735_p5, 1, 0 }
   0xc   : > { %p1440_p6 = pneg %p1735_p5  ;;  %s28_s13 = sadd.s32 1, %s1647_s26 }
   0xd   : > { %s25_s14 = ssub.s32 %s1651_s27, %s1748_s12  ;;  %s1555_s17 = scalar_lea.hbm %s1943_s1, 6272 }
   0xe   : > { %p1743_p7 = pnand %p1440_p6, %p1723_p1  ;;  %p1556_p8 = scmp.ne.s32.totalorder %s1943_s1, %s1555_s17 }
   0xf   : > { %p1562_p12 = scmp.lt.u32.totalorder %s1555_s17, %s1943_s1 }
  0x10   : > { %p1557_p9 = pneg %p1743_p7 }
  0x12   : > { %p1558_p10 = pnand %p1557_p9, %p1556_p8 }
  0x14   : > { %p1559_p11 = pneg %p1558_p10 }
  0x16   : > { %p1564_p13 = pnand %p1562_p12, %p1559_p11 }
  0x18   : > { %1567 = shalt.err (!%p1564_p13)
}
  0x19   : > { %s1568_s22 = scalar_lea.vmem %s217_s10, 6272  ;;  %p1576_p6 = scmp.lt.s32.totalorder %s217_s10, %s217_s10 }
  0x1a   : > { %p1569_p0 = scmp.ne.s32.totalorder %s217_s10, %s1568_s22  ;;  %p1577_p1 = scmp.lt.s32.totalorder %s1568_s22, %s1568_s22 }
  0x1c   : > { %p1571_p2 = pnand %p1569_p0, %p1557_p9  ;;  %p1578_p4 = por %p1577_p1, %p1576_p6 }
  0x1e   : > { %p1572_p3 = pneg %p1571_p2 }
  0x20   : > { %p1579_p5 = pnand %p1578_p4, %p1572_p3 }
  0x22   : > { %1582 = shalt.err (!%p1579_p5)
}
  0x23   : > { %s1654_s23 = smov 64   ;;  %s1655_s24 = smov 4  }
  0x24   : > { %1443 = dma.hbm_to_vmem [thread:$0]  (!%p1743_p7), %s1943_s1, 6272, %s217_s10, [#allocation5], %s1654_s23, %s1654_s23, %s1655_s24  }
  0x25   : > { %p26_p8 = scmp.eq.s32.totalorder %s25_s14, 0  ;;  %p35_p9 = scmp.ne.s32.totalorder %s1647_s26, %s1643_s25 }
  0x26   : > { %p36_p1 = scmp.eq.s32.totalorder %s1651_s27, 0  ;;  %p1449_p4 = scmp.lt.s32.totalorder %s1651_s27, 4 }
  0x27   : > { %s1774_s16 = scalar_select %p26_p8, %s1647_s26, %s28_s13  }
  0x28   : > { %p37_p5 = por %p36_p1, %p35_p9  ;;  %s245_s17 = sand.u32 1, %s1647_s26  }
  0x29   : > { %s1431_s18 = smul.u32 112, %s245_s17  ;;  %s1789_s22 = scalar_lea.sflag [#allocation3], %s245_s17 }
  0x2a   : > { %s1432_s19 = smul.u32 1792, %s1651_s27  ;;  %p1778_p10 = pnand %p1449_p4, %p37_p5 }
  0x2b   : > { %s249_s13 = scalar_lea.vmem [#allocation2], %s1431_s18  ;;  %s1588_s15 = scalar_lea.hbm %s1942_s0, 7168 }
  0x2c   : > { %s1785_s10 = scalar_lea.hbm %s1942_s0, %s1432_s19  ;;  %s257_s14 = sshll.u32 %s249_s13, 4  ;;  %s1787_s14 = int_to_ptr.vmem [resolvable:$true] %s257_s14 }
  0x2d   : > { %s1583_s23 = scalar_lea.hbm %s1785_s10, 1792  ;;  %p1585_p11 = pneg %p1778_p10 }
  0x2e   : > { %p1584_p7 = scmp.ne.s32.totalorder %s1785_s10, %s1583_s23  ;;  %p1589_p0 = scmp.lt.u32.totalorder %s1785_s10, %s1942_s0 }
  0x2f   : > { %p1590_p2 = scmp.lt.u32.totalorder %s1588_s15, %s1583_s23  ;;  %p1592_p6 = scmp.lt.u32.totalorder %s1583_s23, %s1785_s10 }
  0x30   : > { %p1586_p12 = pnand %p1585_p11, %p1584_p7 }
  0x31   : > { %p1591_p3 = por %p1590_p2, %p1589_p0 }
  0x32   : > { %p1587_p13 = pneg %p1586_p12 }
  0x33   : > { %p1593_p8 = por %p1592_p6, %p1591_p3 }
  0x35   : > { %p1594_p9 = pnand %p1593_p8, %p1587_p13 }
  0x37   : > { %1597 = shalt.err (!%p1594_p9)
}
  0x38   : > { %s1598_s17 = scalar_lea.vmem %s1787_s14, 1792  ;;  %s1656_s18 = smov [#allocation2]  }
  0x39   : > { %p1599_p1 = scmp.ne.s32.totalorder %s1787_s14, %s1598_s17  ;;  %s1603_s11 = sshll.u32 %s1656_s18, 4  ;;  %s1604_s11 = int_to_ptr.vmem [resolvable:$false] %s1603_s11 }
  0x3a   : > { %s1605_s13 = scalar_lea.vmem %s1604_s11, 3584  ;;  %p1606_p7 = scmp.lt.s32.totalorder %s1787_s14, %s1604_s11 }
  0x3b   : > { %p1601_p4 = pnand %p1599_p1, %p1585_p11  ;;  %p1607_p12 = scmp.lt.s32.totalorder %s1605_s13, %s1598_s17 }
  0x3d   : > { %p1602_p5 = pneg %p1601_p4  ;;  %p1608_p0 = por %p1607_p12, %p1606_p7 }
  0x3f   : > { %p1609_p2 = pnand %p1608_p0, %p1602_p5 }
  0x41   : > { %1612 = shalt.err (!%p1609_p2)
}
  0x42   : > { %s1657_s23 = smov 896   ;;  %s1658_s24 = smov 56  }
  0x43   : > { %1447 = dma.hbm_to_vmem [thread:$0]  (!%p1778_p10), %s1785_s10, 1792, %s1787_s14, %s1789_s22, %s1657_s23, %s1657_s23, %s1658_s24  }
  0x44   : > { %p1959_p11 = scmp.ne.s32.totalorder %s1956_s8, 0 }
  0x45   : > { %s271_s9 = sand.u32 (!%p1959_p11), 1, %s1643_s25   ;;  %p1960_p13 = scmp.ne.s32.totalorder (!%p1959_p11), %s1955_s30, 0 }
  0x46   : > { %269 = sbr.rel (%p1959_p11) target bundleno = 808 (0x328), region = 48  ;;  %s272_s19 = scalar_lea.sflag (!%p1959_p11), [#allocation3], %s271_s9 }
  0x47   : > { %s1433_s15 = smul.u32 (!%p1959_p11), 112, %s271_s9 }
  0x49   : > { %s1820_s21 = scalar_lea.vmem (!%p1959_p11), [#allocation2], %s1433_s15 }
  0x4d   : > { %1630 = dma.done.wait (%p1960_p13), %s272_s19, 1792  }
  0x4e   : > { %1632 = vsyncadd (%p1960_p13), %s272_s19, 4294965504  ;;  %p1961_p3 = scmp.ne.s32.totalorder %s1954_s29, 0 }
  0x50   : > { %1634 = dma.done.wait (%p1961_p3), [#allocation5], 6272  }
  0x51   : > { %1636 = vsyncadd (%p1961_p3), [#allocation5], 4294961024  ;;  %v1490_v0 = vld [vmem:[#allocation4 + $0x40] sm:$0xff]   ;;  %v1494_v4 = vld [vmem:[#allocation4 + $0x48] sm:$0xff]   ;;  %v1659_v43 = vmov 0.0   ;;  %vm1660_vm0 = vmmov 0  }
  0x52   : > { %v1491_v1 = vld [vmem:[#allocation4] sm:$0xff]   ;;  %1299 = vmatprep.subr.bf16.mxu0 %v1490_v0  ;;  %v1495_v5 = vld [vmem:[#allocation4 + $0x8] sm:$0xff]   ;;  %v1498_v8 = vld [vmem:[#allocation4 + $0x50] sm:$0xff]   ;;  %vm738_vm1 = vcmask 130048   ;;  %s1226_s8 = sshll.u32 %s1216_s28, 1  ;;  %vm1136_vm2 = vcmask 261120  }
  0x53   : > { %v1492_v2 = vld [vmem:[#allocation4 + $0xc0] sm:$0xff]   ;;  %1300 = vmatpush3.bf16.msra.mxu0 %v1491_v1  ;;  %v1496_v6 = vld [vmem:[#allocation4 + $0xc8] sm:$0xff]   ;;  %v1499_v9 = vld [vmem:[#allocation4 + $0x10] sm:$0xff]   ;;  %p312_p10 = scmp.lt.s32.totalorder %s1226_s8, 7 }
  0x54   : > { %v1493_v3 = vld [vmem:[#allocation4 + $0x80] sm:$0xff]   ;;  %1321 = vmatprep.subr.bf16.mxu1 %v1492_v2  ;;  %1301 = vmatprep.subr.bf16.mxu0 %v1494_v4  ;;  %v1497_v7 = vld [vmem:[#allocation4 + $0x88] sm:$0xff]   ;;  %v1500_v10 = vld [vmem:[#allocation4 + $0xd0] sm:$0xff]  }
  0x55   : > { %1322 = vmatpush3.bf16.msra.mxu1 %v1493_v3  ;;  %v1501_v11 = vld [vmem:[#allocation4 + $0x90] sm:$0xff]   ;;  %v1502_v12 = vld [vmem:[#allocation4 + $0x58] sm:$0xff]   ;;  %v1506_v16 = vld [vmem:[#allocation4 + $0x60] sm:$0xff]   ;;  %s1967_s8 = smov (!%p312_p10, %s1226_s8), 7 }
  0x56   : > { %1323 = vmatprep.subr.bf16.mxu1 %v1496_v6  ;;  %v1503_v13 = vld [vmem:[#allocation4 + $0x18] sm:$0xff]   ;;  %v1507_v17 = vld [vmem:[#allocation4 + $0x20] sm:$0xff]   ;;  %v1510_v20 = vld [vmem:[#allocation4 + $0x68] sm:$0xff]   ;;  %s1227_s20 = sshll.u32 %s1967_s8, 3 }
  0x57   : > { %1302 = vmatpush3.bf16.msra.mxu0 %v1495_v5  ;;  %v1504_v14 = vld [vmem:[#allocation4 + $0xd8] sm:$0xff]   ;;  %v1508_v18 = vld [vmem:[#allocation4 + $0xe0] sm:$0xff]   ;;  %v1511_v21 = vld [vmem:[#allocation4 + $0x28] sm:$0xff]   ;;  %s315_s18 = scalar_lea.vmem %s1949_s7, %s1227_s20 }
  0x58   : > { %1303 = vmatprep.subr.bf16.mxu0 %v1498_v8  ;;  %v1505_v15 = vld [vmem:[#allocation4 + $0x98] sm:$0xff]   ;;  %v1509_v19 = vld [vmem:[#allocation4 + $0xa0] sm:$0xff]   ;;  %v1512_v22 = vld [vmem:[#allocation4 + $0xe8] sm:$0xff]  }
  0x59   : > { %1324 = vmatpush3.bf16.msra.mxu1 %v1497_v7  ;;  %v1513_v23 = vld [vmem:[#allocation4 + $0xa8] sm:$0xff]   ;;  %v1514_v24 = vld [vmem:[#allocation4 + $0x70] sm:$0xff]   ;;  %v1518_v28 = vld [vmem:[#allocation4 + $0x78] sm:$0xff]  }
  0x5a   : > { %1325 = vmatprep.subr.bf16.mxu1 %v1500_v10  ;;  %v1515_v25 = vld [vmem:[#allocation4 + $0x30] sm:$0xff]   ;;  %v1519_v29 = vld [vmem:[#allocation4 + $0x38] sm:$0xff]   ;;  %v1522_v38 = vld [vmem:[#allocation4 + $0x140] sm:$0xff]  }
  0x5b   : > { %1304 = vmatpush3.bf16.msra.mxu0 %v1499_v9  ;;  %v1516_v26 = vld [vmem:[#allocation4 + $0xf0] sm:$0xff]   ;;  %v1520_v30 = vld [vmem:[#allocation4 + $0xf8] sm:$0xff]   ;;  %v1523_v42 = vld [vmem:[#allocation4 + $0x100] sm:$0xff]  }
  0x5c   : > { %1305 = vmatprep.subr.bf16.mxu0 %v1502_v12  ;;  %v1517_v27 = vld [vmem:[#allocation4 + $0xb0] sm:$0xff]   ;;  %v319_v31 = vld [vmem:[%s1820_s21 + $0x8] sm:$0xff]  ;;  %v325_v36 = vld [vmem:[%s1820_s21 + $0x38] sm:$0xff] }
  0x5d   : > { %1326 = vmatpush3.bf16.msra.mxu1 %v1501_v11  ;;  %v326_v32 = vld [vmem:[%s1820_s21 + $0x40] sm:$0xff]  ;;  %v1521_v34 = vld [vmem:[#allocation4 + $0xb8] sm:$0xff]   ;;  %v328_v40 = vld [vmem:[%s1820_s21 + $0x50] sm:$0xff] }
  0x5e   : > { %1327 = vmatprep.subr.bf16.mxu1 %v1504_v14  ;;  %v333_v33 = vpack.c.bf16 %v326_v32, %v319_v31  ;;  %v318_v35 = vld [vmem:[%s1820_s21] sm:$0xff]  ;;  %v321_v39 = vld [vmem:[%s1820_s21 + $0x18] sm:$0xff]  ;;  %v320_v44 = vld [vmem:[%s1820_s21 + $0x10] sm:$0xff] }
  0x5f   : > { %1306 = vmatpush3.bf16.msra.mxu0 %v1503_v13  ;;  %v332_v37 = vpack.c.bf16 %v325_v36, %v318_v35  ;;  %v335_v41 = vpack.c.bf16 %v328_v40, %v321_v39  ;;  %v327_v45 = vld [vmem:[%s1820_s21 + $0x48] sm:$0xff]  ;;  %v1526_v49 = vld [vmem:[#allocation4 + $0x150] sm:$0xff]   ;;  %v1530_v53 = vld [vmem:[#allocation4 + $0x160] sm:$0xff]  }
  0x60   : > { %1307 = vmatprep.subr.bf16.mxu0 %v1506_v16  ;;  %774 = vmatprep.mubr.bf16.mxu0 %v333_v33  ;;  %v334_v46 = vpack.c.bf16 %v327_v45, %v320_v44  ;;  %v1524_v47 = vld [vmem:[#allocation4 + $0x148] sm:$0xff]   ;;  %v1527_v50 = vld [vmem:[#allocation4 + $0x110] sm:$0xff]   ;;  %v1528_v51 = vld [vmem:[#allocation4 + $0x158] sm:$0xff]  }
  0x61   : > { %1328 = vmatpush3.bf16.msra.mxu1 %v1505_v15  ;;  %815 = vmatprep.mubr.bf16.mxu1 %v335_v41  ;;  %v1525_v48 = vld [vmem:[#allocation4 + $0x108] sm:$0xff]   ;;  %v1529_v52 = vld [vmem:[#allocation4 + $0x118] sm:$0xff]   ;;  %v1531_v54 = vld [vmem:[#allocation4 + $0x120] sm:$0xff]  }
  0x62   : > { %1329 = vmatprep.subr.bf16.mxu1 %v1508_v18  ;;  %v1532_v55 = vld [vmem:[#allocation4 + $0x168] sm:$0xff]   ;;  %v1538_v56 = vld [vmem:[#allocation4 + $0x180] sm:$0xff]   ;;  %v1534_v59 = vld [vmem:[#allocation4 + $0x170] sm:$0xff]  }
  0x63   : > { %1308 = vmatpush3.bf16.msra.mxu0 %v1507_v17  ;;  %v323_v57 = vld [vmem:[%s1820_s21 + $0x28] sm:$0xff]  ;;  %v330_v60 = vld [vmem:[%s1820_s21 + $0x60] sm:$0xff]  ;;  %v324_v62 = vld [vmem:[%s1820_s21 + $0x30] sm:$0xff] }
  0x64   : > { %1309 = vmatprep.subr.bf16.mxu0 %v1510_v20  ;;  %v1533_v58 = vld [vmem:[#allocation4 + $0x128] sm:$0xff]   ;;  %v337_v61 = vpack.c.bf16 %v330_v60, %v323_v57  ;;  %v1535_v1 = vld [vmem:[#allocation4 + $0x130] sm:$0xff]   ;;  %v1536_v2 = vld [vmem:[#allocation4 + $0x178] sm:$0xff]  }
  0x65   : > { %1330 = vmatpush3.bf16.msra.mxu1 %v1509_v19  ;;  %v331_v63 = vld [vmem:[%s1820_s21 + $0x68] sm:$0xff]  ;;  %v322_v4 = vld [vmem:[%s1820_s21 + $0x20] sm:$0xff]  ;;  %v329_v5 = vld [vmem:[%s1820_s21 + $0x58] sm:$0xff] }
  0x66   : > { %1331 = vmatprep.subr.bf16.mxu1 %v1512_v22  ;;  %v338_v0 = vpack.c.bf16 %v331_v63, %v324_v62  ;;  %v1537_v3 = vld [vmem:[#allocation4 + $0x138] sm:$0xff]   ;;  %v336_v6 = vpack.c.bf16 %v329_v5, %v322_v4  ;;  %v1539_v7 = vld [vmem:[%s1945_s3] sm:$0xff]   ;;  %v1540_v8 = vld [vmem:[%s1945_s3 + $0x8] sm:$0xff]  }
  0x67   : > { %1310 = vmatpush3.bf16.msra.mxu0 %v1511_v21  ;;  %v1541_v9 = vld [vmem:[%s1945_s3 + $0x10] sm:$0xff]   ;;  %v1542_v10 = vld [vmem:[%s1945_s3 + $0x18] sm:$0xff]   ;;  %v1543_v11 = vld [vmem:[%s1945_s3 + $0x20] sm:$0xff]  }
  0x68   : > { %1311 = vmatprep.subr.bf16.mxu0 %v1514_v24  ;;  %v1544_v12 = vld [vmem:[%s1945_s3 + $0x28] sm:$0xff]   ;;  %v1545_v13 = vld [vmem:[%s1945_s3 + $0x30] sm:$0xff]   ;;  %v1546_v14 = vld [vmem:[%s1945_s3 + $0x38] sm:$0xff]  }
  0x69   : > { %1332 = vmatpush3.bf16.msra.mxu1 %v1513_v23  ;;  %v1547_v15 = vld [vmem:[%s1947_s5] sm:$0xff]   ;;  %v1548_v16 = vld [vmem:[%s1947_s5 + $0x8] sm:$0xff]   ;;  %v1549_v17 = vld [vmem:[%s1947_s5 + $0x10] sm:$0xff]  }
  0x6a   : > { %1333 = vmatprep.subr.bf16.mxu1 %v1516_v26  ;;  %v1550_v18 = vld [vmem:[%s1947_s5 + $0x18] sm:$0xff]   ;;  %v1551_v19 = vld [vmem:[%s1947_s5 + $0x20] sm:$0xff]   ;;  %v1552_v20 = vld [vmem:[%s1947_s5 + $0x28] sm:$0xff]  }
  0x6b   : > { %1312 = vmatpush3.bf16.msra.mxu0 %v1515_v25  ;;  %v1228_v22 = vld [vmem:[%s1944_s2] ss:$0 sm:$0xff]  ;;  %v1554_v57 = vld [vmem:[%s1947_s5 + $0x38] sm:$0xff]  }
  0x6c   : > { %1313 = vmatprep.subr.bf16.mxu0 %v1518_v28 }
  0x6d   : > { %1334 = vmatpush3.bf16.msra.mxu1 %v1517_v27 }
  0x6e   : > { %1335 = vmatprep.subr.bf16.mxu1 %v1520_v30 }
  0x6f   : > { %1314 = vmatpush3.bf16.msra.mxu0 %v1519_v29 }
  0x70   : > { %1343 = vmatprep.subr.bf16.mxu0 %v1522_v38 }
  0x71   : > { %1336 = vmatpush3.bf16.msra.mxu1 %v1521_v34 }
  0x72   : > { %1385 = vmatprep.subr.bf16.mxu1 %v1659_v43  ;;  %775 = vmatmul.mubr.bf16.vlgmr.msra.gmra.mrb[0].mxu0 %v332_v37 }
  0x73   : > { %1344 = vmatpush3.bf16.msra.mxu0 %v1523_v42  ;;  %856 = vmatprep.mubr.bf16.mxu0 %v337_v61 }
  0x74   : > { %816 = vmatmul.mubr.bf16.vlgmr.msra.gmra.mrb[0].mxu1 %v334_v46  ;;  %1345 = vmatprep.subr.bf16.mxu0 %v1524_v47 }
  0x75   : > { %1387 = vmatprep.mubr.msk.bf16.mxu1 %vm1660_vm0, %v1659_v43  ;;  %1386 = vmatpush3.bf16.msra.mxu1 %v1538_v56  ;;  %v1553_v56 = vld [vmem:[%s1947_s5 + $0x30] sm:$0xff]  }
  0x76   : > { %1391 = vmatprep.subr.bf16.mxu1 %v1659_v43 }
  0x77   : > { %1346 = vmatpush3.bf16.msra.mxu0 %v1525_v48 }
  0x78   : > { %1347 = vmatprep.subr.bf16.mxu0 %v1526_v49 }
  0x7b   : > { %1348 = vmatpush3.bf16.msra.mxu0 %v1527_v50 }
  0x7c   : > { %1349 = vmatprep.subr.bf16.mxu0 %v1528_v51  ;;  %1388 = vmatmul.mubr.msk.bf16.vlgmr.msra.gmra.mrb[4].mxu1 %vm738_vm1, %v338_v0 }
  0x7d   : > { %1407 = vmatprep.mubr.msk.bf16.mxu1 %vm1660_vm0, %v1659_v43  ;;  %1392 = vmatpush3.bf16.msra.mxu1 %v1539_v7 }
  0x7e   : > { %1393 = vmatprep.subr.bf16.mxu1 %v1659_v43 }
  0x7f   : > { %1350 = vmatpush3.bf16.msra.mxu0 %v1529_v52 }
  0x80   : > { %1351 = vmatprep.subr.bf16.mxu0 %v1530_v53 }
  0x81   : > { %1394 = vmatpush3.bf16.msra.mxu1 %v1540_v8 }
  0x82   : > { %1395 = vmatprep.subr.bf16.mxu1 %v1659_v43 }
  0x83   : > { %1352 = vmatpush3.bf16.msra.mxu0 %v1531_v54 }
  0x84   : > { %1353 = vmatprep.subr.bf16.mxu0 %v1532_v55 }
  0x85   : > { %1396 = vmatpush3.bf16.msra.mxu1 %v1541_v9 }
  0x86   : > { %1397 = vmatprep.subr.bf16.mxu1 %v1659_v43 }
  0x87   : > { %1354 = vmatpush3.bf16.msra.mxu0 %v1533_v58  ;;  %v1279_v58 = vld [vmem:[%s1946_s4] ss:$0 sm:$0xff] }
  0x88   : > { %1355 = vmatprep.subr.bf16.mxu0 %v1534_v59 }
  0x89   : > { %1398 = vmatpush3.bf16.msra.mxu1 %v1542_v10 }
  0x8a   : > { %1399 = vmatprep.subr.bf16.mxu1 %v1659_v43 }
  0x8b   : > { %1356 = vmatpush3.bf16.msra.mxu0 %v1535_v1 }
  0x8c   : > { %1357 = vmatprep.subr.bf16.mxu0 %v1536_v2 }
  0x8d   : > { %1400 = vmatpush3.bf16.msra.mxu1 %v1543_v11 }
  0x8e   : > { %1401 = vmatprep.subr.bf16.mxu1 %v1659_v43 }
  0x8f   : > { %1358 = vmatpush3.bf16.msra.mxu0 %v1537_v3 }
  0x90   : > { %1411 = vmatprep.subr.bf16.mxu0 %v1659_v43 }
  0x91   : > { %1402 = vmatpush3.bf16.msra.mxu1 %v1544_v12 }
  0x92   : > { %857 = vmatmul.mubr.bf16.vlgmr.msra.gmra.mrb[4].mxu0 %v336_v6  ;;  %1403 = vmatprep.subr.bf16.mxu1 %v1659_v43 }
  0x93   : > { %1427 = vmatprep.mubr.msk.bf16.mxu0 %vm1660_vm0, %v1659_v43  ;;  %1412 = vmatpush3.bf16.msra.mxu0 %v1547_v15 }
  0x94   : > { %1413 = vmatprep.subr.bf16.mxu0 %v1659_v43 }
  0x95   : > { %1404 = vmatpush3.bf16.msra.mxu1 %v1545_v13 }
  0x96   : > { %1405 = vmatprep.subr.bf16.mxu1 %v1659_v43 }
  0x97   : > { %1414 = vmatpush3.bf16.msra.mxu0 %v1548_v16 }
  0x98   : > { %1415 = vmatprep.subr.bf16.mxu0 %v1659_v43 }
  0x99   : > { %1406 = vmatpush3.bf16.msra.mxu1 %v1546_v14 }
  0x9b   : > { %1416 = vmatpush3.bf16.msra.mxu0 %v1549_v17 }
  0x9c   : > { %1417 = vmatprep.subr.bf16.mxu0 %v1659_v43 }
  0x9f   : > { %1418 = vmatpush3.bf16.msra.mxu0 %v1550_v18 }
  0xa0   : > { %1419 = vmatprep.subr.bf16.mxu0 %v1659_v43 }
  0xa3   : > { %1420 = vmatpush3.bf16.msra.mxu0 %v1551_v19 }
  0xa4   : > { %1421 = vmatprep.subr.bf16.mxu0 %v1659_v43 }
  0xa7   : > { %1422 = vmatpush3.bf16.msra.mxu0 %v1552_v20 }
  0xa8   : > { %1423 = vmatprep.subr.bf16.mxu0 %v1659_v43 }
  0xab   : > { %1424 = vmatpush3.bf16.msra.mxu0 %v1553_v56 }
  0xac   : > { %1425 = vmatprep.subr.bf16.mxu0 %v1659_v43  ;;  %v1288_v43 = vld [vmem:[%s1948_s6] ss:$0 sm:$0xff] }
  0xaf   : > { %1426 = vmatpush3.bf16.msra.mxu0 %v1554_v57 }
 0x145   : > { %v1315_v21 = vpop.f32.mrb[0].mxu0 }
 0x146   : > { %v1316_v23 = vpop.f32.mrb[1].mxu0 }
 0x147   : > { %v1317_v24 = vadd.f32 %v1316_v23, %v1315_v21  ;;  %v1318_v25 = vpop.f32.mrb[2].mxu0  ;;  %v1337_v26 = vpop.f32.mrb[0].mxu1 }
 0x148   : > { %v1319_v27 = vpop.f32.mrb[3].mxu0  ;;  %v1338_v30 = vpop.f32.mrb[1].mxu1 }
 0x149   : > { %v777_v28 = vadd.f32 %v1317_v24, %v1228_v22  ;;  %v1320_v29 = vadd.f32 %v1319_v27, %v1318_v25  ;;  %v1339_v31 = vadd.f32 %v1338_v30, %v1337_v26  ;;  %v1340_v32 = vpop.f32.mrb[2].mxu1 }
 0x14a   : > { %v1341_v34 = vpop.f32.mrb[3].mxu1 }
 0x14b   : > { %v780_v33 = vadd.f32 %v1320_v29, %v1228_v22  ;;  %v818_v35 = vadd.f32 %v1339_v31, %v777_v28  ;;  %v1342_v36 = vadd.f32 %v1341_v34, %v1340_v32 }
 0x14d   : > { %v821_v37 = vadd.f32 %v1342_v36, %v780_v33 }
 0x14f   : > { %v899_v38 = vpop.f32.mrb[4].mxu1 }
 0x150   : > { %v1389_v39 = vpop.f32.mrb[5].mxu1 }
 0x151   : > { %v902_v40 = vpop.f32.mrb[6].mxu1 }
 0x152   : > { %v1390_v41 = vpop.f32.mrb[7].mxu1 }
 0x165   : > { %v1359_v42 = vpop.f32.mrb[4].mxu0 }
 0x166   : > { %v1360_v44 = vpop.f32.mrb[5].mxu0 }
 0x167   : > { %v1361_v45 = vadd.f32 %v1360_v44, %v1359_v42  ;;  %v1362_v46 = vpop.f32.mrb[6].mxu0 }
 0x168   : > { %v1363_v47 = vpop.f32.mrb[7].mxu0 }
 0x169   : > { %v859_v48 = vadd.f32 %v1361_v45, %v818_v35  ;;  %v1364_v49 = vadd.f32 %v1363_v47, %v1362_v46 }
 0x16b   : > { %v900_v50 = vadd.f32 %v899_v38, %v859_v48  ;;  %v862_v51 = vadd.f32 %v1364_v49, %v821_v37 }
 0x16d   : > { %v903_v52 = vadd.f32 %v902_v40, %v862_v51  ;;  %v906_v53 = vmax.f32 %v900_v50, 0.0 }
 0x16f   : > { %v907_v54 = vmax.f32 %v903_v52, 0.0 }
 0x171   : > { %v908_v55 = vpack.c.bf16 %v907_v54, %v906_v53 }
 0x173   : > { %1408 = vmatmul.mubr.bf16.vlgmr.msra.gmra.mrb[8].mxu1 %v908_v55 }
 0x246   : > { %v1014_v59 = vpop.f32.mrb[8].mxu1 }
 0x247   : > { %v1015_v60 = vadd.f32 %v1279_v58, %v1014_v59  ;;  %v1409_v61 = vpop.f32.mrb[9].mxu1 }
 0x248   : > { %v1017_v62 = vpop.f32.mrb[10].mxu1 }
 0x249   : > { %v1018_v63 = vadd.f32 %v1279_v58, %v1017_v62  ;;  %v1410_v0 = vpop.f32.mrb[11].mxu1  ;;  %v1021_v1 = vmax.f32 %v1015_v60, 0.0 }
 0x24b   : > { %v1022_v2 = vmax.f32 %v1018_v63, 0.0 }
 0x24d   : > { %v1023_v3 = vpack.c.bf16 %v1022_v2, %v1021_v1 }
 0x24f   : > { %1428 = vmatmul.mubr.bf16.vlgmr.msra.gmra.mrb[8].mxu0 %v1023_v3 }
 0x322   : > { %v1129_v4 = vpop.f32.mrb[8].mxu0 }
 0x323   : > { %v1130_v5 = vadd.f32 %v1288_v43, %v1129_v4  ;;  %v1429_v6 = vpop.f32.mrb[9].mxu0 }
 0x324   : > { %v1132_v7 = vpop.f32.mrb[10].mxu0 }
 0x325   : > { %1137 = vst.msk [vmem:[%s315_s18] sm:$0xff] %vm1136_vm2, %v1130_v5  ;;  %v1133_v8 = vadd.f32 %v1288_v43, %v1132_v7  ;;  %v1430_v9 = vpop.f32.mrb[11].mxu0 }
 0x327   : > { %1138 = vst.msk [vmem:[%s315_s18 + $0x8] sm:$0xff] %vm1136_vm2, %v1133_v8 }
 0x328 PF: > { %p18_p6 = scmp.ge.s32.totalorder %s1748_s12, 6   ;;  %s1962_s24 = smov %s1643_s25 }
 0x329   : > { %s1963_s25 = smov %s1647_s26  ;;  %s1964_s26 = smov %s1774_s16 }
 0x32a   : > { %s1965_s27 = smov %s1748_s12  ;;  %20 = sbr.rel (!%p18_p6) target bundleno = 4 (0x4), region = 92 }
 0x331   :  { %1161 = vsyncpa [#allocation3], 1 }
 0x332   :  { %1163 = vsyncpa [#allocation3 + $0x1], 1 }
 0x333   :  { %1164 = vsyncpa [#allocation5], 1 }

</bundles_post_ra>
